<compile_context>
chip_gen: v7x
topology: tpu7x:2x2x1
jax: 0.10.0
libtpu: 0.0.40
codegen_flags: <defaults>
</compile_context>

<pallas_src>
import jax
import jax.numpy as jnp
from jax.experimental import pallas as pl
from jax.experimental.pallas import tpu as pltpu


def _vmem_capacity_bytes():
    try:
        cap = getattr(pltpu.get_tpu_info(), "vmem_capacity_bytes", None)
        if cap:
            return int(cap)
    except Exception:
        pass
    return 128 * 1024 * 1024


_VMEM_PHYS_BYTES = _vmem_capacity_bytes()
# Scoped limit leaves headroom for Mosaic-internal scratch; the budget is what
# the tile picker plans against (it counts in-kernel intermediates too).
_VMEM_LIMIT_BYTES = min(_VMEM_PHYS_BYTES * 3 // 4, 100 * 1024 * 1024)
_VMEM_BUDGET_BYTES = min(_VMEM_PHYS_BYTES // 2, 80 * 1024 * 1024)


# --------------------------------------------------------------------------
# Fused 3x3 conv + folded BN + ReLU (+fused channel concat, +fused 2x2 maxpool)
# --------------------------------------------------------------------------

def _make_conv3x3_kernel(n_inputs, emit_pool):
    def kernel(*refs):
        x_refs = refs[:n_inputs]            # each (1, 1, TH+2, Wp, Ci) bf16
        w_ref = refs[n_inputs]              # (3, K, Cout) bf16, K = 3*sum(Ci)
        sb_ref = refs[n_inputs + 1]         # (2, Cout) f32 folded BN scale/bias
        o_ref = refs[n_inputs + 2]          # (1, TH, W, Cout) bf16
        th, w_out, cout = o_ref.shape[1], o_ref.shape[2], o_ref.shape[3]

        # Build the 3 dx-shifted bf16 views once per tile and group them (and
        # the fused channel concat of multiple inputs) along the contraction
        # dim -> K = 3*sum(Ci) per dy matmul.
        # TODO(synk): use pltpu.roll for the dx shifts to avoid offset-slice
        # relayouts on the sublane (W) axis.
        parts = []
        for i in range(n_inputs):
            t = x_refs[i][0, 0]                                  # (TH+2, Wp, Ci)
            parts.append(t[:, 0:w_out, :])
            parts.append(t[:, 1:w_out + 1, :])
            parts.append(t[:, 2:w_out + 2, :])
        xsh = jnp.concatenate(parts, axis=-1)                    # (TH+2, W, K)
        k = xsh.shape[-1]

        acc = None
        for dy in range(3):
            rows = xsh[dy:dy + th].reshape(th * w_out, k)        # bf16
            part = jnp.dot(rows, w_ref[dy],
                           preferred_element_type=jnp.float32)   # MXU, f32 acc
            acc = part if acc is None else acc + part

        y = jnp.maximum(acc * sb_ref[0:1, :] + sb_ref[1:2, :], 0.0)   # BN + ReLU
        y3 = y.reshape(th, w_out, cout)
        o_ref[0] = y3.astype(o_ref.dtype)

        if emit_pool:
            op_ref = refs[n_inputs + 3]     # (1, TH//2, W//2, Cout)
            # width pairs (sublane reduce), then row pairs (leading-dim reduce)
            zw = jnp.max(y3.reshape(th, w_out // 2, 2, cout), axis=2)
            zp = jnp.max(zw.reshape(th // 2, 2, w_out // 2, cout), axis=1)
            op_ref[0] = zp.astype(op_ref.dtype)

    return kernel


def _conv_footprint_bytes(th, w, cins, cout, emit_pool):
    """Approximate per-grid-step VMEM working set (incl. in-kernel values)."""
    wp = w + 2
    k = 3 * sum(cins)
    b = 0
    for c in cins:
        b += 2 * (th + 2) * wp * c * 2          # windowed input block, 2x buffered
    b += (th + 2) * w * k * 2                   # xsh (dx-grouped) bf16
    b += th * w * k * 2                         # per-dy row slice bf16
    b += th * w * cout * 4                      # f32 accumulator / epilogue
    b += 2 * th * w * cout * 2                  # output block, 2x buffered
    if emit_pool:
        b += 2 * (th // 2) * max(w // 2, 1) * cout * 2
    b += 2 * 3 * k * cout * 2                   # dy-stacked weights (2x to be safe)
    b += 2 * 2 * cout * 4                       # scale/bias
    return b


def _pick_conv_tile_rows(n, h, w, cins, cout, emit_pool):
    """Largest even divisor of H whose true working set fits the VMEM budget."""
    if h <= 2:
        return h
    cands = [d for d in range(2, h + 1, 2) if h % d == 0]
    if not cands:
        return h
    if n < 2:
        # Keep >=2 grid points so megacore (v7x) can shard the grid.
        multi = [d for d in cands if h // d >= 2]
        if multi:
            cands = multi
    fit = [d for d in cands
           if _conv_footprint_bytes(d, w, cins, cout, emit_pool) <= _VMEM_BUDGET_BYTES]
    return max(fit) if fit else min(cands)


def conv3x3_bn_relu(xs, ws, scale, bias, *, emit_pool=False, tile_rows=None):
    """Fused 3x3 conv (+implicit channel concat of `xs`) + folded BN + ReLU.

    xs: list of (N, H, W, Ci) arrays (concatenated along C conceptually).
    ws: list of (3, 3, Ci, Cout) HWIO weights matching xs.
    scale, bias: (Cout,) folded BatchNorm scale / bias.
    Returns (N, H, W, Cout) bf16; with emit_pool also (N, H//2, W//2, Cout) bf16.
    """
    xs, ws = list(xs), list(ws)
    n_in = len(xs)
    n, h, w, _ = (int(s) for s in xs[0].shape)
    cins = [int(x.shape[-1]) for x in xs]
    cout = int(ws[0].shape[-1])
    wp = w + 2

    th = (_pick_conv_tile_rows(n, h, w, cins, cout, emit_pool)
          if tile_rows is None else int(tile_rows))
    assert h % th == 0, (h, th)
    if emit_pool:
        assert th % 2 == 0 and w % 2 == 0, (th, w)
    nh = h // th

    # Pad + overlapping-window stack, fused into one XLA copy.  The kernel then
    # reads plain blocked (1,1,TH+2,Wp,Ci) tiles (auto-pipelined, no halo concat).
    # TODO(synk): remove this HBM round trip by handling the border in-kernel.
    xws = []
    for x in xs:
        xp = jnp.pad(x.astype(jnp.bfloat16), ((0, 0), (1, 1), (1, 1), (0, 0)))
        win = [xp[:, j * th:j * th + th + 2] for j in range(nh)]
        xws.append(jnp.stack(win, axis=1))                 # (N, nh, TH+2, Wp, Ci)

    # Weights regrouped as (dy, [input-major, dx-major, Ci-minor], Cout) to match
    # the kernel's xsh channel order -> one deep matmul per dy.
    w3 = jnp.concatenate(
        [wt.astype(jnp.bfloat16).reshape(3, 3 * c, cout) for wt, c in zip(ws, cins)],
        axis=1)                                            # (3, K, Cout)
    sb = jnp.stack([scale, bias], axis=0).astype(jnp.float32)     # (2, Cout)

    in_specs = [pl.BlockSpec((1, 1, th + 2, wp, c), lambda i, j: (i, j, 0, 0, 0))
                for c in cins]
    in_specs.append(pl.BlockSpec((3, 3 * sum(cins), cout), lambda i, j: (0, 0, 0)))
    in_specs.append(pl.BlockSpec((2, cout), lambda i, j: (0, 0)))

    full_shape = jax.ShapeDtypeStruct((n, h, w, cout), jnp.bfloat16)
    full_spec = pl.BlockSpec((1, th, w, cout), lambda i, j: (i, j, 0, 0))
    if emit_pool:
        out_shape = (full_shape,
                     jax.ShapeDtypeStruct((n, h // 2, w // 2, cout), jnp.bfloat16))
        out_specs = (full_spec,
                     pl.BlockSpec((1, th // 2, w // 2, cout),
                                  lambda i, j: (i, j, 0, 0)))
    else:
        out_shape = full_shape
        out_specs = full_spec

    flops = 2 * 9 * n * h * w * sum(cins) * cout
    bytes_acc = (sum(n * nh * (th + 2) * wp * c * 2 for c in cins)
                 + n * h * w * cout * 2
                 + 9 * sum(cins) * cout * 2)

    return pl.pallas_call(
        _make_conv3x3_kernel(n_in, emit_pool),
        out_shape=out_shape,
        grid=(n, nh),
        in_specs=in_specs,
        out_specs=out_specs,
        compiler_params=pltpu.CompilerParams(
            dimension_semantics=("parallel", "parallel"),
            vmem_limit_bytes=_VMEM_LIMIT_BYTES),
        cost_estimate=pl.CostEstimate(
            flops=flops, transcendentals=0, bytes_accessed=bytes_acc),
    )(*xws, w3, sb)


# --------------------------------------------------------------------------
# Fused 1x1 conv + sigmoid, lane-dense transposed output (direct NCHW order)
# --------------------------------------------------------------------------

def _conv1x1_sigmoid_kernel(x_ref, w_ref, b_ref, o_ref):
    # x_ref: (1, TH, W, Cin) bf16 ; w_ref: (Cout, Cin) bf16 ; b_ref: (Cout, 1) f32
    # o_ref: (1, Cout, TH*W) f32 -- lane axis is the (large) spatial dim.
    _, th, w, cin = x_ref.shape
    x = x_ref[0].reshape(th * w, cin)                        # bf16, no cast trip
    yt = jax.lax.dot_general(w_ref[...], x, (((1,), (1,)), ((), ())),
                             preferred_element_type=jnp.float32)  # (Cout, TH*W)
    o_ref[0] = jax.nn.sigmoid(yt + b_ref[...])


def conv1x1_sigmoid(x, w, b):
    """x: (N, H, W, Cin); w: (Cin, Cout); b: (Cout,). Returns (N, Cout, H*W) f32."""
    n, h, wd, cin = (int(s) for s in x.shape)
    cout = int(w.shape[-1])

    xb = x.astype(jnp.bfloat16)
    wt = w.astype(jnp.bfloat16).T                            # (Cout, Cin)
    b2 = b.astype(jnp.float32).reshape(cout, 1)

    def fp(d):                                               # per-step VMEM bytes
        return 2 * d * wd * cin * 2 + 2 * cout * d * wd * 4 + d * wd * cout * 4

    cands = [d for d in range(1, h + 1) if h % d == 0 and fp(d) <= _VMEM_BUDGET_BYTES]
    if not cands:
        cands = [1]
    lane_ok = [d for d in cands if (d * wd) % 128 == 0]      # lane-dense store
    th = max(lane_ok) if lane_ok else max(cands)
    nh = h // th

    return pl.pallas_call(
        _conv1x1_sigmoid_kernel,
        out_shape=jax.ShapeDtypeStruct((n, cout, h * wd), jnp.float32),
        grid=(n, nh),
        in_specs=[
            pl.BlockSpec((1, th, wd, cin), lambda i, j: (i, j, 0, 0)),
            pl.BlockSpec((cout, cin), lambda i, j: (0, 0)),
            pl.BlockSpec((cout, 1), lambda i, j: (0, 0)),
        ],
        out_specs=pl.BlockSpec((1, cout, th * wd), lambda i, j: (i, 0, j)),
        compiler_params=pltpu.CompilerParams(
            dimension_semantics=("parallel", "parallel"),
            vmem_limit_bytes=_VMEM_LIMIT_BYTES),
        cost_estimate=pl.CostEstimate(
            flops=2 * n * h * wd * cin * cout,
            transcendentals=n * h * wd * cout,
            bytes_accessed=n * h * wd * cin * 2 + n * cout * h * wd * 4
            + cin * cout * 2),
    )(xb, wt, b2)


# --------------------------------------------------------------------------
# Glue (plain JAX): gather-free bilinear upsample (bf16), decoder wiring
# --------------------------------------------------------------------------

def _interp_matrix(insz):
    # Dense (2*insz, insz) bilinear interpolation matrix, align_corners=True.
    outsz = 2 * insz
    if insz == 1:
        return jnp.ones((outsz, 1), jnp.float32)
    pos = jnp.arange(outsz, dtype=jnp.float32) * ((insz - 1) / (outsz - 1))
    lo = jnp.clip(jnp.floor(pos).astype(jnp.int32), 0, insz - 2)
    frac = pos - lo.astype(jnp.float32)
    return (jax.nn.one_hot(lo, insz, dtype=jnp.float32) * (1.0 - frac)[:, None]
            + jax.nn.one_hot(lo + 1, insz, dtype=jnp.float32) * frac[:, None])


def _upsample2x_bilinear(x):
    # nn.Upsample(scale_factor=2, mode='bilinear', align_corners=True), no
    # gathers; activations kept bf16 (f32 accumulate via dtype promotion).
    # TODO(synk): fuse the upsample into the Up conv kernel to avoid the HBM
    # materialization of the 4x-larger activation.
    uh = _interp_matrix(int(x.shape[1]))
    uw = _interp_matrix(int(x.shape[2]))
    y = jnp.einsum('oh,nhwc->nowc', uh, x.astype(jnp.bfloat16)).astype(jnp.bfloat16)
    y = jnp.einsum('pw,nowc->nopc', uw, y).astype(jnp.bfloat16)
    return y


def _double_conv(x, p, *, emit_pool=False):
    x = conv3x3_bn_relu([x], [p[0]["w"]], p[0]["scale"], p[0]["bias"])
    return conv3x3_bn_relu([x], [p[1]["w"]], p[1]["scale"], p[1]["bias"],
                           emit_pool=emit_pool)


def _up(x1, x2, p):
    x1 = _upsample2x_bilinear(x1)
    dh = x2.shape[1] - x1.shape[1]
    dw = x2.shape[2] - x1.shape[2]
    if dh or dw:
        x1 = jnp.pad(x1, ((0, 0), (dh // 2, dh - dh // 2),
                          (dw // 2, dw - dw // 2), (0, 0)))
    # torch.cat([x2, x1], dim=1) fused into the conv: split W along Cin.
    c2 = int(x2.shape[-1])
    w = p[0]["w"]
    x = conv3x3_bn_relu([x2, x1], [w[:, :, :c2, :], w[:, :, c2:, :]],
                        p[0]["scale"], p[0]["bias"])
    return conv3x3_bn_relu([x], [p[1]["w"]], p[1]["scale"], p[1]["bias"])


# --------------------------------------------------------------------------
# Parameter init (deterministic, synthetic) with BN folding (inference mode)
# --------------------------------------------------------------------------

def _init_conv_bn(key, cin, cout):
    ks = jax.random.split(key, 6)
    w = jax.random.normal(ks[0], (3, 3, cin, cout), jnp.float32) * (2.0 / (9 * cin)) ** 0.5
    conv_b = 0.01 * jax.random.normal(ks[1], (cout,), jnp.float32)
    gamma = 1.0 + 0.1 * jax.random.normal(ks[2], (cout,), jnp.float32)
    beta = 0.1 * jax.random.normal(ks[3], (cout,), jnp.float32)
    running_mean = 0.1 * jax.random.normal(ks[4], (cout,), jnp.float32)
    running_var = 1.0 + 0.1 * jax.random.uniform(ks[5], (cout,), jnp.float32)
    eps = 1e-5
    scale = gamma / jnp.sqrt(running_var + eps)
    bias = (conv_b - running_mean) * scale + beta
    return {"w": w, "scale": scale, "bias": bias}


def _init_double_conv(key, cin, cout):
    k1, k2 = jax.random.split(key)
    return (_init_conv_bn(k1, cin, cout), _init_conv_bn(k2, cout, cout))


def init_unet_params(key, n_channels, n_classes):
    keys = jax.random.split(key, 11)
    return {
        "inc":   _init_double_conv(keys[0], n_channels, 64),
        "down1": _init_double_conv(keys[1], 64, 128),
        "down2": _init_double_conv(keys[2], 128, 256),
        "down3": _init_double_conv(keys[3], 256, 512),
        "down4": _init_double_conv(keys[4], 512, 512),
        "up1":   _init_double_conv(keys[5], 1024, 256),
        "up2":   _init_double_conv(keys[6], 512, 128),
        "up3":   _init_double_conv(keys[7], 256, 64),
        "up4":   _init_double_conv(keys[8], 128, 64),
        "outc_w": jax.random.normal(keys[9], (64, n_classes), jnp.float32) * (1.0 / 64) ** 0.5,
        "outc_b": 0.01 * jax.random.normal(keys[10], (n_classes,), jnp.float32),
    }


# --------------------------------------------------------------------------
# UNet forward
# --------------------------------------------------------------------------

@jax.jit
def unet_forward(x_nchw, params):
    n, _, h, w = x_nchw.shape
    x = jnp.transpose(x_nchw, (0, 2, 3, 1))                        # NCHW -> NHWC
    x1, x1p = _double_conv(x, params["inc"], emit_pool=True)       # fused maxpool
    x2, x2p = _double_conv(x1p, params["down1"], emit_pool=True)
    x3, x3p = _double_conv(x2p, params["down2"], emit_pool=True)
    x4, x4p = _double_conv(x3p, params["down3"], emit_pool=True)
    x5 = _double_conv(x4p, params["down4"])
    y = _up(x5, x4, params["up1"])
    y = _up(y, x3, params["up2"])
    y = _up(y, x2, params["up3"])
    y = _up(y, x1, params["up4"])
    y = conv1x1_sigmoid(y, params["outc_w"], params["outc_b"])     # (N, nc, H*W)
    return y.reshape(n, -1, h, w)


# --------------------------------------------------------------------------
# Self-test: tiled / fused-concat / fused-pool conv path + full forward
# --------------------------------------------------------------------------

def _conv3x3_bn_relu_reference(x, w, scale, bias):
    y = jax.lax.conv_general_dilated(
        x, w, window_strides=(1, 1), padding="SAME",
        dimension_numbers=("NHWC", "HWIO", "NHWC"),
        precision=jax.lax.Precision.HIGHEST)
    return jnp.maximum(y * scale + bias, 0.0)


if __name__ == "__main__":
    key = jax.random.PRNGKey(0)
    kx, kp, kt = jax.random.split(key, 3)

    # ---- sanity: H-tiled halo windows + fused channel concat + fused pool ---
    ks = jax.random.split(kt, 5)
    xa = jax.random.normal(ks[0], (1, 8, 8, 16), jnp.float32)
    xb = jax.random.normal(ks[1], (1, 8, 8, 16), jnp.float32)
    wc = 0.1 * jax.random.normal(ks[2], (3, 3, 32, 24), jnp.float32)
    sc = 1.0 + 0.1 * jax.random.normal(ks[3], (24,), jnp.float32)
    bi = 0.1 * jax.random.normal(ks[4], (24,), jnp.float32)

    y_ref = _conv3x3_bn_relu_reference(jnp.concatenate([xa, xb], -1), wc, sc, bi)
    y_one = conv3x3_bn_relu([xa, xb], [wc[:, :, :16, :], wc[:, :, 16:, :]],
                            sc, bi, tile_rows=8)
    y_til, y_pool = conv3x3_bn_relu([xa, xb], [wc[:, :, :16, :], wc[:, :, 16:, :]],
                                    sc, bi, tile_rows=2, emit_pool=True)
    assert jnp.allclose(y_one.astype(jnp.float32), y_ref, atol=0.1, rtol=0.1)
    assert jnp.allclose(y_til.astype(jnp.float32), y_one.astype(jnp.float32),
                        atol=1e-2, rtol=1e-2)
    p_ref = jnp.max(y_til.astype(jnp.float32).reshape(1, 4, 2, 4, 2, 24), axis=(2, 4))
    assert jnp.allclose(y_pool.astype(jnp.float32), p_ref, atol=1e-2, rtol=1e-2)

    # ---- full UNet forward ---------------------------------------------------
    N, C, H, W = 2, 4, 16, 16
    n_classes = 2
    x = jax.random.normal(kx, (N, C, H, W), jnp.float32)
    params = init_unet_params(kp, C, n_classes)

    out = jax.block_until_ready(unet_forward(x, params))

    assert out.shape == (N, n_classes, H, W), out.shape
    assert bool(jnp.all(jnp.isfinite(out)))
    assert bool(jnp.all((out >= 0.0) & (out <= 1.0)))   # sigmoid output range
    print("KERNEL_OK")
</pallas_src>

<mosaic_0001>
module attributes {stable_mosaic.version = 11 : i64} {
  func.func @kernel(%arg0: i32, %arg1: i32, %arg2: memref<1x1x10x10x16xbf16, #tpu.memory_space<vmem>>, %arg3: memref<1x1x10x10x16xbf16, #tpu.memory_space<vmem>>, %arg4: memref<3x96x24xbf16, #tpu.memory_space<vmem>>, %arg5: memref<2x24xf32, #tpu.memory_space<vmem>>, %arg6: memref<1x8x8x24xbf16, #tpu.memory_space<vmem>>) attributes {dimension_semantics = [#tpu.dimension_semantics<parallel>, #tpu.dimension_semantics<parallel>], iteration_bounds = array<i64: 1, 1>, scalar_prefetch = 0 : i64, scratch_operands = 0 : i64, tpu.core_type = #tpu.core_type<tc>, window_params = [{transform_indices = @transform_0, window_bounds = array<i64: 1, 1, 10, 10, 16>}, {transform_indices = @transform_1, window_bounds = array<i64: 1, 1, 10, 10, 16>}, {pipeline_mode = #tpu.pipeline_mode<synchronous>, transform_indices = @transform_2, window_bounds = array<i64: 3, 96, 24>}, {pipeline_mode = #tpu.pipeline_mode<synchronous>, transform_indices = @transform_3, window_bounds = array<i64: 2, 24>}, {transform_indices = @transform_4, window_bounds = array<i64: 1, 8, 8, 24>}]} {
    %c0 = arith.constant 0 : index
    %c0_0 = arith.constant 0 : index
    %c0_1 = arith.constant 0 : index
    %c0_2 = arith.constant 0 : index
    %c0_3 = arith.constant 0 : index
    %0 = vector.load %arg2[%c0, %c0_0, %c0_1, %c0_2, %c0_3] : memref<1x1x10x10x16xbf16, #tpu.memory_space<vmem>>, vector<1x1x10x10x16xbf16>
    %1 = vector.shape_cast %0 : vector<1x1x10x10x16xbf16> to vector<10x10x16xbf16>
    %2 = vector.extract_strided_slice %1 {offsets = [0, 0, 0], sizes = [10, 8, 16], strides = [1, 1, 1]} : vector<10x10x16xbf16> to vector<10x8x16xbf16>
    %3 = vector.extract_strided_slice %1 {offsets = [0, 1, 0], sizes = [10, 8, 16], strides = [1, 1, 1]} : vector<10x10x16xbf16> to vector<10x8x16xbf16>
    %4 = vector.extract_strided_slice %1 {offsets = [0, 2, 0], sizes = [10, 8, 16], strides = [1, 1, 1]} : vector<10x10x16xbf16> to vector<10x8x16xbf16>
    %c0_4 = arith.constant 0 : index
    %c0_5 = arith.constant 0 : index
    %c0_6 = arith.constant 0 : index
    %c0_7 = arith.constant 0 : index
    %c0_8 = arith.constant 0 : index
    %5 = vector.load %arg3[%c0_4, %c0_5, %c0_6, %c0_7, %c0_8] : memref<1x1x10x10x16xbf16, #tpu.memory_space<vmem>>, vector<1x1x10x10x16xbf16>
    %6 = vector.shape_cast %5 : vector<1x1x10x10x16xbf16> to vector<10x10x16xbf16>
    %7 = vector.extract_strided_slice %6 {offsets = [0, 0, 0], sizes = [10, 8, 16], strides = [1, 1, 1]} : vector<10x10x16xbf16> to vector<10x8x16xbf16>
    %8 = vector.extract_strided_slice %6 {offsets = [0, 1, 0], sizes = [10, 8, 16], strides = [1, 1, 1]} : vector<10x10x16xbf16> to vector<10x8x16xbf16>
    %9 = vector.extract_strided_slice %6 {offsets = [0, 2, 0], sizes = [10, 8, 16], strides = [1, 1, 1]} : vector<10x10x16xbf16> to vector<10x8x16xbf16>
    %10 = tpu.concatenate %2, %3, %4, %7, %8, %9 in 2 : vector<10x8x16xbf16>, vector<10x8x16xbf16>, vector<10x8x16xbf16>, vector<10x8x16xbf16>, vector<10x8x16xbf16>, vector<10x8x16xbf16> -> vector<10x8x96xbf16>
    %11 = vector.extract_strided_slice %10 {offsets = [0, 0, 0], sizes = [8, 8, 96], strides = [1, 1, 1]} : vector<10x8x96xbf16> to vector<8x8x96xbf16>
    %12 = vector.shape_cast %11 : vector<8x8x96xbf16> to vector<64x96xbf16>
    %c0_9 = arith.constant 0 : index
    %c0_10 = arith.constant 0 : index
    %c0_11 = arith.constant 0 : index
    %13 = vector.load %arg4[%c0_9, %c0_10, %c0_11] : memref<3x96x24xbf16, #tpu.memory_space<vmem>>, vector<1x96x24xbf16>
    %14 = vector.shape_cast %13 : vector<1x96x24xbf16> to vector<96x24xbf16>
    %cst = arith.constant dense<0.000000e+00> : vector<64x24xf32>
    %15 = tpu.matmul %12, %14, %cst {dimension_numbers = #tpu.dot_dimension_numbers<[1], [0], [0], [1], [0, 0, 1, 1], [], []>} : vector<64x96xbf16>, vector<96x24xbf16>, vector<64x24xf32> -> vector<64x24xf32>
    %16 = vector.extract_strided_slice %10 {offsets = [1, 0, 0], sizes = [8, 8, 96], strides = [1, 1, 1]} : vector<10x8x96xbf16> to vector<8x8x96xbf16>
    %17 = vector.shape_cast %16 : vector<8x8x96xbf16> to vector<64x96xbf16>
    %c1 = arith.constant 1 : index
    %c0_12 = arith.constant 0 : index
    %c0_13 = arith.constant 0 : index
    %18 = vector.load %arg4[%c1, %c0_12, %c0_13] : memref<3x96x24xbf16, #tpu.memory_space<vmem>>, vector<1x96x24xbf16>
    %19 = vector.shape_cast %18 : vector<1x96x24xbf16> to vector<96x24xbf16>
    %cst_14 = arith.constant dense<0.000000e+00> : vector<64x24xf32>
    %20 = tpu.matmul %17, %19, %cst_14 {dimension_numbers = #tpu.dot_dimension_numbers<[1], [0], [0], [1], [0, 0, 1, 1], [], []>} : vector<64x96xbf16>, vector<96x24xbf16>, vector<64x24xf32> -> vector<64x24xf32>
    %21 = arith.addf %15, %20 : vector<64x24xf32>
    %22 = vector.extract_strided_slice %10 {offsets = [2, 0, 0], sizes = [8, 8, 96], strides = [1, 1, 1]} : vector<10x8x96xbf16> to vector<8x8x96xbf16>
    %23 = vector.shape_cast %22 : vector<8x8x96xbf16> to vector<64x96xbf16>
    %c2 = arith.constant 2 : index
    %c0_15 = arith.constant 0 : index
    %c0_16 = arith.constant 0 : index
    %24 = vector.load %arg4[%c2, %c0_15, %c0_16] : memref<3x96x24xbf16, #tpu.memory_space<vmem>>, vector<1x96x24xbf16>
    %25 = vector.shape_cast %24 : vector<1x96x24xbf16> to vector<96x24xbf16>
    %cst_17 = arith.constant dense<0.000000e+00> : vector<64x24xf32>
    %26 = tpu.matmul %23, %25, %cst_17 {dimension_numbers = #tpu.dot_dimension_numbers<[1], [0], [0], [1], [0, 0, 1, 1], [], []>} : vector<64x96xbf16>, vector<96x24xbf16>, vector<64x24xf32> -> vector<64x24xf32>
    %27 = arith.addf %21, %26 : vector<64x24xf32>
    %c0_18 = arith.constant 0 : index
    %c0_19 = arith.constant 0 : index
    %28 = vector.load %arg5[%c0_18, %c0_19] : memref<2x24xf32, #tpu.memory_space<vmem>>, vector<1x24xf32>
    %29 = vector.broadcast %28 : vector<1x24xf32> to vector<64x24xf32>
    %30 = arith.mulf %27, %29 : vector<64x24xf32>
    %c1_20 = arith.constant 1 : index
    %c0_21 = arith.constant 0 : index
    %31 = vector.load %arg5[%c1_20, %c0_21] : memref<2x24xf32, #tpu.memory_space<vmem>>, vector<1x24xf32>
    %32 = vector.broadcast %31 : vector<1x24xf32> to vector<64x24xf32>
    %33 = arith.addf %30, %32 : vector<64x24xf32>
    %cst_22 = arith.constant 0.000000e+00 : f32
    %34 = vector.broadcast %cst_22 : f32 to vector<64x24xf32>
    %35 = arith.maximumf %33, %34 : vector<64x24xf32>
    %36 = vector.shape_cast %35 : vector<64x24xf32> to vector<8x8x24xf32>
    %37 = arith.truncf %36 : vector<8x8x24xf32> to vector<8x8x24xbf16>
    %c0_23 = arith.constant 0 : index
    %c0_24 = arith.constant 0 : index
    %c0_25 = arith.constant 0 : index
    %c0_26 = arith.constant 0 : index
    %38 = vector.load %arg6[%c0_23, %c0_24, %c0_25, %c0_26] : memref<1x8x8x24xbf16, #tpu.memory_space<vmem>>, vector<1x8x8x24xbf16>
    %39 = vector.shape_cast %38 : vector<1x8x8x24xbf16> to vector<8x8x24xbf16>
    %40 = vector.shape_cast %37 : vector<8x8x24xbf16> to vector<1x8x8x24xbf16>
    tpu.vector_store %arg6[%c0_23, %c0_24, %c0_25, %c0_26], %40 {strides = array<i32>} : memref<1x8x8x24xbf16, #tpu.memory_space<vmem>>, vector<1x8x8x24xbf16>,
    return
  }
  func.func @transform_0(%arg0: i32, %arg1: i32) -> (i32, i32, i32, i32, i32) {
    %c0_i32 = arith.constant 0 : i32
    %c0_i32_0 = arith.constant 0 : i32
    %c0_i32_1 = arith.constant 0 : i32
    %c0_i32_2 = arith.constant 0 : i32
    return %arg0, %arg1, %c0_i32, %c0_i32_0, %c0_i32_1 : i32, i32, i32, i32, i32
  }
  func.func @transform_1(%arg0: i32, %arg1: i32) -> (i32, i32, i32, i32, i32) {
    %c0_i32 = arith.constant 0 : i32
    %c0_i32_0 = arith.constant 0 : i32
    %c0_i32_1 = arith.constant 0 : i32
    %c0_i32_2 = arith.constant 0 : i32
    return %arg0, %arg1, %c0_i32, %c0_i32_0, %c0_i32_1 : i32, i32, i32, i32, i32
  }
  func.func @transform_2(%arg0: i32, %arg1: i32) -> (i32, i32, i32) {
    %c0_i32 = arith.constant 0 : i32
    %c0_i32_0 = arith.constant 0 : i32
    %c0_i32_1 = arith.constant 0 : i32
    %c0_i32_2 = arith.constant 0 : i32
    return %c0_i32, %c0_i32_0, %c0_i32_1 : i32, i32, i32
  }
  func.func @transform_3(%arg0: i32, %arg1: i32) -> (i32, i32) {
    %c0_i32 = arith.constant 0 : i32
    %c0_i32_0 = arith.constant 0 : i32
    %c0_i32_1 = arith.constant 0 : i32
    return %c0_i32, %c0_i32_0 : i32, i32
  }
  func.func @transform_4(%arg0: i32, %arg1: i32) -> (i32, i32, i32, i32) {
    %c0_i32 = arith.constant 0 : i32
    %c0_i32_0 = arith.constant 0 : i32
    %c0_i32_1 = arith.constant 0 : i32
    return %arg0, %arg1, %c0_i32, %c0_i32_0 : i32, i32, i32, i32
  }
}

</mosaic_0001>

<bundles_post_ra>
// kernel: tpu_custom_call.1
= control target key start
LH: loop header
LB: loop body
LE: loop exit
PB: predicated region body
PF: predicated region fallthrough
CT: control target
= control target key end

     0   :  { %9 = vsyncpa [#allocation3], 0  ;;  %s1754_s0 = inlined_call_operand.hbm [shape: bf16[1,1,10,10,16], index: 0, kind: input, shape index: {}]   ;;  %s1755_s1 = inlined_call_operand.hbm [shape: bf16[1,1,10,10,16], index: 1, kind: input, shape index: {}]   ;;  %s1756_s2 = inlined_call_operand.hbm [shape: bf16[3,96,24], index: 2, kind: input, shape index: {}]   ;;  %s1757_s3 = inlined_call_operand.hbm [shape: f32[2,24], index: 3, kind: input, shape index: {}]   ;;  %s1758_s4 = inlined_call_operand.hbm [shape: bf16[1,8,8,24], index: 4, kind: output, shape index: {}]  }
   0x1   :  { %10 = vsyncpa [#allocation6], 0 }
   0x2   :  { %11 = vsyncpa [#allocation9], 0 }
   0x3   :  { %12 = vsyncpa [#allocation4], 0  ;;  %s1439_s15 = smov [#allocation5]   ;;  %s1440_s17 = smov [#allocation2]  }
   0x4   :  { %s30_s16 = sshll.u32 %s1439_s15, 4  ;;  %s18_s18 = sshll.u32 %s1440_s17, 4  ;;  %s31_s16 = int_to_ptr.vmem [resolvable:$true] %s30_s16  ;;  %s1475_s18 = int_to_ptr.vmem [resolvable:$true] %s18_s18 }
   0x5   :  { %s1321_s21 = scalar_lea.hbm %s1755_s1, 1280 }
   0x6   :  { %p1322_p0 = scmp.ne.s32.totalorder %s1755_s1, %s1321_s21  ;;  %p1325_p1 = scmp.lt.u32.totalorder %s1321_s21, %s1755_s1 }
   0x8   :  { %p1327_p2 = pnand %p1325_p1, %p1322_p0 }
   0xa   :  { %1330 = shalt.err (!%p1327_p2)
}
   0xb   :  { %s1331_s26 = scalar_lea.vmem %s31_s16, 1280  ;;  %p1336_p4 = scmp.lt.s32.totalorder %s31_s16, %s31_s16 }
   0xc   :  { %p1332_p3 = scmp.ne.s32.totalorder %s31_s16, %s1331_s26  ;;  %p1337_p5 = scmp.lt.s32.totalorder %s1331_s26, %s1331_s26 }
   0xe   :  { %p1338_p6 = por %p1337_p5, %p1336_p4 }
  0x10   :  { %p1339_p7 = pnand %p1338_p6, %p1332_p3 }
  0x12   :  { %1342 = shalt.err (!%p1339_p7)
}
  0x13   :  { %s1441_s27 = smov 64   ;;  %s1442_s28 = smov 4  }
  0x14   :  { %36 = dma.hbm_to_vmem [thread:$0]  %s1755_s1, 1280, %s31_s16, [#allocation6], %s1441_s27, %s1441_s27, %s1442_s28  }
  0x15   :  { %s1343_s7 = scalar_lea.hbm %s1754_s0, 1280 }
  0x16   :  { %p1344_p8 = scmp.ne.s32.totalorder %s1754_s0, %s1343_s7  ;;  %p1347_p9 = scmp.lt.u32.totalorder %s1343_s7, %s1754_s0 }
  0x18   :  { %p1349_p10 = pnand %p1347_p9, %p1344_p8 }
  0x1a   :  { %1352 = shalt.err (!%p1349_p10)
}
  0x1b   :  { %s1353_s12 = scalar_lea.vmem %s1475_s18, 1280  ;;  %p1358_p12 = scmp.lt.s32.totalorder %s1475_s18, %s1475_s18 }
  0x1c   :  { %p1354_p11 = scmp.ne.s32.totalorder %s1475_s18, %s1353_s12  ;;  %p1359_p13 = scmp.lt.s32.totalorder %s1353_s12, %s1353_s12 }
  0x1e   :  { %p1360_p0 = por %p1359_p13, %p1358_p12 }
  0x20   :  { %p1361_p1 = pnand %p1360_p0, %p1354_p11 }
  0x22   :  { %1364 = shalt.err (!%p1361_p1)
}
  0x23   :  { %24 = dma.hbm_to_vmem [thread:$0]  %s1754_s0, 1280, %s1475_s18, [#allocation3], %s1441_s27, %s1441_s27, %s1442_s28  }
  0x24   :  { %s1443_s14 = smov [#allocation7]   ;;  %s1444_s16 = smov [#allocation8]  }
  0x25   :  { %s42_s15 = sshll.u32 %s1443_s14, 4  ;;  %s55_s17 = sshll.u32 %s1444_s16, 4  ;;  %s43_s15 = int_to_ptr.vmem [resolvable:$true] %s42_s15  ;;  %s56_s17 = int_to_ptr.vmem [resolvable:$true] %s55_s17 }
  0x26   :  { %s1365_s21 = scalar_lea.hbm %s1756_s2, 2304 }
  0x27   :  { %p1366_p2 = scmp.ne.s32.totalorder %s1756_s2, %s1365_s21  ;;  %p1369_p3 = scmp.lt.u32.totalorder %s1365_s21, %s1756_s2 }
  0x29   :  { %p1371_p4 = pnand %p1369_p3, %p1366_p2 }
  0x2b   :  { %1374 = shalt.err (!%p1371_p4)
}
  0x2c   :  { %s1375_s0 = scalar_lea.vmem %s43_s15, 2304  ;;  %p1380_p6 = scmp.lt.s32.totalorder %s43_s15, %s43_s15 }
  0x2d   :  { %p1376_p5 = scmp.ne.s32.totalorder %s43_s15, %s1375_s0  ;;  %p1381_p7 = scmp.lt.s32.totalorder %s1375_s0, %s1375_s0 }
  0x2f   :  { %p1382_p8 = por %p1381_p7, %p1380_p6 }
  0x31   :  { %p1383_p9 = pnand %p1382_p8, %p1376_p5 }
  0x33   :  { %1386 = shalt.err (!%p1383_p9)
}
  0x34   :  { %48 = dma.hbm_to_vmem [thread:$0]  %s1756_s2, 2304, %s43_s15, [#allocation6], %s1441_s27, %s1441_s27, %s1442_s28  }
  0x35   :  { %s1387_s5 = scalar_lea.hbm %s1757_s3, 32 }
  0x36   :  { %p1388_p10 = scmp.ne.s32.totalorder %s1757_s3, %s1387_s5  ;;  %p1391_p11 = scmp.lt.u32.totalorder %s1387_s5, %s1757_s3 }
  0x38   :  { %p1393_p12 = pnand %p1391_p11, %p1388_p10 }
  0x3a   :  { %1396 = shalt.err (!%p1393_p12)
}
  0x3b   :  { %s1397_s10 = scalar_lea.vmem %s56_s17, 32  ;;  %p1402_p0 = scmp.lt.s32.totalorder %s56_s17, %s56_s17 }
  0x3c   :  { %p1398_p13 = scmp.ne.s32.totalorder %s56_s17, %s1397_s10  ;;  %p1403_p1 = scmp.lt.s32.totalorder %s1397_s10, %s1397_s10 }
  0x3e   :  { %p1404_p2 = por %p1403_p1, %p1402_p0 }
  0x40   :  { %p1405_p3 = pnand %p1404_p2, %p1398_p13 }
  0x42   :  { %1408 = shalt.err (!%p1405_p3)
}
  0x43   :  { %58 = dma.hbm_to_vmem [thread:$0]  %s1757_s3, 32, %s56_s17, [#allocation9]  }
  0x44   :  { %1431 = dma.done.wait [#allocation3], 1280  }
  0x45   :  { %1432 = vsyncadd [#allocation3], 4294966016 }
  0x46   :  { %1433 = dma.done.wait [#allocation6], 3584  }
  0x47   :  { %1434 = vsyncadd [#allocation6], 4294963712 }
  0x48   :  { %1435 = dma.done.wait [#allocation9], 32  }
  0x49   :  { %1436 = vsyncadd [#allocation9], 4294967264  ;;  %v1539_v0 = vld [vmem:[#allocation2 + $0x8] sm:$0xf]  ;;  %v75_v1 = vld [vmem:[#allocation2 + $0xc] sm:$0x1] }
  0x4a   :  { %v1541_v2 = vld [vmem:[#allocation2] sm:$0xf]  ;;  %v1074_v3 = vcombine.low %v1539_v0, %v75_v1  ;;  %v73_v4 = vld [vmem:[#allocation2 + $0x4] sm:$0x1]  ;;  %v1544_v5 = vld [vmem:[#allocation2 + $0x18] sm:$0xf] }
  0x4b   :  { %v79_v6 = vld [vmem:[#allocation2 + $0x1c] sm:$0x1]  ;;  %v1073_v7 = vcombine.low %v1541_v2, %v73_v4  ;;  %v1548_v9 = vld [vmem:[#allocation2 + $0x10] sm:$0xf]  ;;  %v77_v10 = vld [vmem:[#allocation2 + $0x14] sm:$0x1] }
  0x4c   :  { %v1076_v8 = vcombine.low %v1544_v5, %v79_v6  ;;  %v253_v11 = vrot.slane %v1074_v3, 1  ;;  %v1075_v12 = vcombine.low %v1548_v9, %v77_v10  ;;  %v1551_v13 = vld [vmem:[#allocation2 + $0x20] sm:$0xf]  ;;  %v81_v14 = vld [vmem:[#allocation2 + $0x24] sm:$0x1]  ;;  %s1445_s3 = smov 32  }
  0x4d   :  { %v252_v15 = vrot.slane %v1073_v7, 1  ;;  %v163_v17 = vshrl.u32 %v1073_v7, 16  ;;  %v165_v18 = vshll.u32 %v1073_v7, 16  ;;  %v172_v19 = vshll.u32 %v1074_v3, 16  ;;  %s1446_s12 = smov 16   ;;  %v1303_v39 = vld [vmem:[#allocation7] sm:$0xff]  }
  0x4e   :  { %264 = vrot.lane.b32.xlu0 %v253_v11, %s1445_s3  ;;  %v255_v16 = vrot.slane %v1076_v8, 1  ;;  %v254_v20 = vrot.slane %v1075_v12, 1  ;;  %v1077_v21 = vcombine.low %v1551_v13, %v81_v14  ;;  %v179_v22 = vshll.u32 %v1075_v12, 16  ;;  %v93_v38 = vld [vmem:[#allocation5 + $0x4] sm:$0x1]  ;;  %1194 = vmatprep.subr.bf16.mxu0 %v1303_v39  ;;  %v1305_v47 = vld [vmem:[#allocation7 + $0x8] sm:$0xff]  }
  0x4f   :  { %262 = vrot.lane.b32.xlu1 %v252_v15, %s1445_s3  ;;  %v167_v23 = vrot.slane %v165_v18, 1  ;;  %v170_v25 = vshrl.u32 %v1074_v3, 16  ;;  %v174_v26 = vrot.slane %v172_v19, 1  ;;  %v177_v29 = vshrl.u32 %v1075_v12, 16  ;;  %v92_v41 = vld [vmem:[#allocation5] sm:$0xf]  ;;  %1195 = vmatpush3.bf16.msra.mxu0 %v1303_v39 }
  0x50   :  { %v193_v27 = vshll.u32 %v1077_v21, 16  ;;  %v256_v28 = vrot.slane %v1077_v21, 1  ;;  %v181_v30 = vrot.slane %v179_v22, 1  ;;  %v186_v31 = vshll.u32 %v1076_v8, 16  ;;  %v97_v42 = vld [vmem:[#allocation5 + $0x14] sm:$0x1]  ;;  %1196 = vmatprep.subr.bf16.mxu0 %v1305_v47 }
  0x51   :  { %v168_v24 = vor.u32 %v167_v23, %v163_v17  ;;  %v175_v32 = vor.u32 %v174_v26, %v170_v25  ;;  %v191_v33 = vshrl.u32 %v1077_v21, 16  ;;  %v184_v36 = vshrl.u32 %v1076_v8, 16  ;;  %v1304_v43 = vld [vmem:[#allocation7 + $0x30] sm:$0xff]   ;;  %v95_v45 = vld [vmem:[#allocation5 + $0xc] sm:$0x1]  ;;  %s1447_s1 = smov 48  }
  0x52   :  { %268 = vrot.lane.b32.xlu0 %v255_v16, %s1445_s3  ;;  %v195_v34 = vrot.slane %v193_v27, 1  ;;  %v182_v35 = vor.u32 %v181_v30, %v177_v29  ;;  %v188_v37 = vrot.slane %v186_v31, 1  ;;  %v1562_v46 = vcombine.low %v92_v41, %v93_v38  ;;  %v94_v48 = vld [vmem:[#allocation5 + $0x8] sm:$0xf]  ;;  %v96_v49 = vld [vmem:[#allocation5 + $0x10] sm:$0xf]  ;;  %1174 = vmatprep.subr.bf16.mxu1 %v1304_v43 }
  0x53   :  { %266 = vrot.lane.b32.xlu1 %v254_v20, %s1445_s3  ;;  %v1564_v50 = vcombine.low %v96_v49, %v97_v42  ;;  %1175 = vmatpush3.bf16.msra.mxu1 %v1304_v43  ;;  %v1567_v51 = vcombine.low %v94_v48, %v95_v45  ;;  %v1083_v52 = vcombine.low %v92_v41, %v92_v41  ;;  %v99_v54 = vld [vmem:[#allocation5 + $0x1c] sm:$0x1]  ;;  %v1306_v56 = vld [vmem:[#allocation7 + $0x38] sm:$0xff]   ;;  %v98_v57 = vld [vmem:[#allocation5 + $0x18] sm:$0xf]  ;;  %s1448_s13 = smov 80  }
  0x54   :  { %v196_v40 = vor.u32 %v195_v34, %v191_v33  ;;  %v189_v44 = vor.u32 %v188_v37, %v184_v36  ;;  %v1084_v53 = vcombine.low %v94_v48, %v94_v48  ;;  %v365_v55 = vshll.u32 %v1562_v46, 16  ;;  %v100_v58 = vld [vmem:[#allocation5 + $0x20] sm:$0xf]  ;;  %v101_v59 = vld [vmem:[#allocation5 + $0x24] sm:$0x1]  ;;  %1197 = vmatpush3.bf16.msra.mxu0 %v1305_v47  ;;  %1176 = vmatprep.subr.bf16.mxu1 %v1306_v56  ;;  %v1308_v4 = vld [vmem:[#allocation7 + $0x40] sm:$0xff]  }
  0x55   :  { %v363_v60 = vshrl.u32 %v1562_v46, 16  ;;  %v379_v61 = vshll.u32 %v1564_v50, 16  ;;  %v1307_v62 = vld [vmem:[#allocation7 + $0x10] sm:$0xff]   ;;  %v1574_v63 = vcombine.low %v98_v57, %v99_v54  ;;  %v1085_v1 = vcombine.low %v96_v49, %v96_v49  ;;  %v1309_v10 = vld [vmem:[#allocation7 + $0x18] sm:$0xff]   ;;  %v1584_v17 = vld [vmem:[#allocation2 + $0x28] sm:$0xf] }
  0x56   :  { %232 = vrot.lane.b32.xlu0 %v168_v24, %s1446_s12  ;;  %v372_v3 = vshll.u32 %v1567_v51, 16  ;;  %v1086_v6 = vcombine.low %v98_v57, %v98_v57  ;;  %v367_v7 = vrot.slane %v365_v55, 1  ;;  %v1578_v8 = vcombine.low %v100_v58, %v101_v59  ;;  %1198 = vmatprep.subr.bf16.mxu0 %v1307_v62  ;;  %v83_v18 = vld [vmem:[#allocation2 + $0x2c] sm:$0x1]  ;;  %v1311_v30 = vld [vmem:[#allocation7 + $0x20] sm:$0xff]   ;;  %v1312_v34 = vld [vmem:[#allocation7 + $0x50] sm:$0xff]  }
  0x57   :  { %270 = vrot.lane.b32.xlu1 %v256_v28, %s1445_s3  ;;  %1177 = vmatpush3.bf16.msra.mxu1 %v1306_v56  ;;  %v1087_v11 = vcombine.low %v100_v58, %v100_v58  ;;  %v377_v12 = vshrl.u32 %v1564_v50, 16  ;;  %v370_v14 = vshrl.u32 %v1567_v51, 16  ;;  %v386_v16 = vshll.u32 %v1574_v63, 16  ;;  %v1310_v22 = vld [vmem:[#allocation7 + $0x48] sm:$0xff]   ;;  %v85_v33 = vld [vmem:[#allocation2 + $0x34] sm:$0x1] }
  0x58   :  { %1199 = vmatpush3.bf16.msra.mxu0 %v1307_v62  ;;  %1178 = vmatprep.subr.bf16.mxu1 %v1308_v4  ;;  %v374_v15 = vrot.slane %v372_v3, 1  ;;  %v368_v19 = vor.u32 %v367_v7, %v363_v60  ;;  %v381_v20 = vrot.slane %v379_v61, 1  ;;  %v393_v21 = vshll.u32 %v1578_v8, 16  ;;  %v1600_v37 = vld [vmem:[#allocation2 + $0x38] sm:$0xf]  ;;  %v1313_v39 = vld [vmem:[#allocation7 + $0x28] sm:$0xff]  }
  0x59   :  { %1200 = vmatprep.subr.bf16.mxu0 %v1309_v10  ;;  %v384_v24 = vshrl.u32 %v1574_v63, 16  ;;  %v388_v25 = vrot.slane %v386_v16, 1  ;;  %v391_v27 = vshrl.u32 %v1578_v8, 16  ;;  %v1593_v29 = vcombine.low %v1584_v17, %v83_v18  ;;  %v87_v38 = vld [vmem:[#allocation2 + $0x3c] sm:$0x1]  ;;  %s1449_s14 = smov [#allocation10]  }
  0x5a   :  { %234 = vrot.lane.b32.xlu0 %v175_v32, %s1446_s12  ;;  %v375_v23 = vor.u32 %v374_v15, %v370_v14  ;;  %v382_v26 = vor.u32 %v381_v20, %v377_v12  ;;  %v395_v28 = vrot.slane %v393_v21, 1  ;;  %v453_v31 = vrot.slane %v1567_v51, 1  ;;  %v1596_v32 = vld [vmem:[#allocation2 + $0x30] sm:$0xf]  ;;  %v1314_v42 = vld [vmem:[#allocation7 + $0x58] sm:$0xff]   ;;  %s1059_s15 = sshll.u32 %s1449_s14, 4  ;;  %s1060_s15 = int_to_ptr.vmem [resolvable:$true] %s1059_s15 }
  0x5b   :  { %236 = vrot.lane.b32.xlu1 %v182_v35, %s1446_s12  ;;  %1179 = vmatpush3.bf16.msra.mxu1 %v1308_v4  ;;  %v389_v35 = vor.u32 %v388_v25, %v384_v24  ;;  %v452_v36 = vrot.slane %v1562_v46, 1  ;;  %v200_v41 = vshll.u32 %v1593_v29, 16  ;;  %v1604_v43 = vld [vmem:[#allocation2 + $0x40] sm:$0xf]  ;;  %v1079_v45 = vcombine.low %v1596_v32, %v85_v33  ;;  %v105_v14 = vld [vmem:[#allocation5 + $0x34] sm:$0x1]  ;;  %p1414_p5 = scmp.lt.s32.totalorder %s1060_s15, %s1060_s15 }
  0x5c   :  { %1201 = vmatpush3.bf16.msra.mxu0 %v1309_v10  ;;  %1180 = vmatprep.subr.bf16.mxu1 %v1310_v22  ;;  %v1080_v46 = vcombine.low %v1600_v37, %v87_v38  ;;  %v454_v47 = vrot.slane %v1564_v50, 1  ;;  %v455_v51 = vrot.slane %v1574_v63, 1  ;;  %v456_v55 = vrot.slane %v1578_v8, 1  ;;  %v102_v8 = vld [vmem:[#allocation5 + $0x28] sm:$0xf]  ;;  %v1625_v10 = vld [vmem:[#allocation7 + $0x60] sm:$0xff]  }
  0x5d   :  { %1202 = vmatprep.subr.bf16.mxu0 %v1311_v30  ;;  %v207_v48 = vshll.u32 %v1079_v45, 16  ;;  %v205_v56 = vshrl.u32 %v1079_v45, 16  ;;  %v257_v4 = vrot.slane %v1593_v29, 1  ;;  %v258_v7 = vrot.slane %v1079_v45, 1  ;;  %v107_v15 = vld [vmem:[#allocation5 + $0x3c] sm:$0x1] }
  0x5e   :  { %240 = vrot.lane.b32.xlu0 %v196_v40, %s1446_s12  ;;  %v396_v40 = vor.u32 %v395_v28, %v391_v27  ;;  %v214_v54 = vshll.u32 %v1080_v46, 16  ;;  %v212_v59 = vshrl.u32 %v1080_v46, 16  ;;  %v104_v16 = vld [vmem:[#allocation5 + $0x30] sm:$0xf]  ;;  %v1088_v21 = vcombine.low %v102_v8, %v102_v8  ;;  %v109_v24 = vld [vmem:[#allocation5 + $0x44] sm:$0x1] }
  0x5f   :  { %238 = vrot.lane.b32.xlu1 %v189_v44, %s1446_s12  ;;  %1181 = vmatpush3.bf16.msra.mxu1 %v1310_v22  ;;  %v89_v44 = vld [vmem:[#allocation2 + $0x44] sm:$0x1]  ;;  %v209_v57 = vrot.slane %v207_v48, 1  ;;  %v1099_v20 = vcombine.low %v104_v16, %v105_v14  ;;  %v108_v25 = vld [vmem:[#allocation5 + $0x40] sm:$0xf]  ;;  %vm482_vm0 = vcmask 130048  }
  0x60   :  { %1203 = vmatpush3.bf16.msra.mxu0 %v1311_v30  ;;  %1182 = vmatprep.subr.bf16.mxu1 %v1312_v34  ;;  %v1081_v49 = vcombine.low %v1604_v43, %v89_v44  ;;  %v216_v60 = vrot.slane %v214_v54, 1  ;;  %v1101_v27 = vcombine.low %v108_v25, %v109_v24  ;;  %v91_v44 = vld [vmem:[#allocation2 + $0x4c] sm:$0x1]  ;;  %v110_v54 = vld [vmem:[#allocation5 + $0x48] sm:$0xf]  ;;  %vm513_vm1 = vcmask 261120  }
  0x61   :  { %1204 = vmatprep.subr.bf16.mxu0 %v1313_v39  ;;  %v210_v61 = vor.u32 %v209_v57, %v205_v56  ;;  %v407_v28 = vshll.u32 %v1099_v20, 16  ;;  %v458_v56 = vrot.slane %v1099_v20, 1  ;;  %vm534_vm2 = vcmask 392192   ;;  %s1409_s16 = scalar_lea.vmem %s1060_s15, 512 }
  0x62   :  { %312 = vrot.lane.b32.xlu0 %v1083_v52, %s1447_s1  ;;  %v198_v52 = vshrl.u32 %v1593_v29, 16  ;;  %v221_v58 = vshll.u32 %v1081_v49, 16  ;;  %v219_v62 = vshrl.u32 %v1081_v49, 16  ;;  %v260_v18 = vrot.slane %v1081_v49, 1  ;;  %p1410_p4 = scmp.ne.s32.totalorder %s1060_s15, %s1409_s16  ;;  %p1415_p6 = scmp.lt.s32.totalorder %s1409_s16, %s1409_s16 }
  0x63   :  { %314 = vrot.lane.b32.xlu1 %v1084_v53, %s1447_s1  ;;  %1183 = vmatpush3.bf16.msra.mxu1 %v1312_v34  ;;  %v202_v53 = vrot.slane %v200_v41, 1  ;;  %v1091_v34 = vcombine.low %v108_v25, %v108_v25  ;;  %v421_v38 = vshll.u32 %v1101_v27, 16  ;;  %vm555_vm3 = vcmask 523264  }
  0x64   :  { %1184 = vmatprep.subr.bf16.mxu1 %v1314_v42  ;;  %1205 = vmatpush3.bf16.msra.mxu0 %v1313_v39  ;;  %v223_v63 = vrot.slane %v221_v58, 1  ;;  %vm576_vm4 = vcmask 654336   ;;  %vm678_vm5 = vcmask 785408   ;;  %vm1045_vm6 = vcmask 191488   ;;  %p1416_p7 = por %p1415_p6, %p1414_p5 }
  0x65   :  { %v203_v50 = vor.u32 %v202_v53, %v198_v52  ;;  %1214 = vmatprep.subr.bf16.mxu0 %v1625_v10 }
  0x66   :  { %316 = vrot.lane.b32.xlu0 %v1085_v1, %s1447_s1  ;;  %v217_v1 = vor.u32 %v216_v60, %v212_v59  ;;  %v224_v3 = vor.u32 %v223_v63, %v219_v62  ;;  %v460_v60 = vrot.slane %v1101_v27, 1  ;;  %p1417_p8 = pnand %p1416_p7, %p1410_p4 }
  0x67   :  { %318 = vrot.lane.b32.xlu1 %v1086_v6, %s1447_s1  ;;  %1185 = vmatpush3.bf16.msra.mxu1 %v1314_v42  ;;  %v103_v6 = vld [vmem:[#allocation5 + $0x2c] sm:$0x1]  ;;  %v1636_v42 = vld [vmem:[#allocation2 + $0x48] sm:$0xf] }
  0x68   :  { %v1098_v12 = vcombine.low %v102_v8, %v103_v6  ;;  %1234 = vmatprep.subr.bf16.mxu1 %v1625_v10  ;;  %v1082_v49 = vcombine.low %v1636_v42, %v91_v44 }
  0x6a   :  { %320 = vrot.lane.b32.xlu0 %v1087_v11, %s1447_s1  ;;  %v259_v11 = vrot.slane %v1080_v46, 1  ;;  %v398_v30 = vshrl.u32 %v1098_v12, 16  ;;  %v419_v46 = vshrl.u32 %v1101_v27, 16  ;;  %v457_v52 = vrot.slane %v1098_v12, 1 }
  0x6b   :  { %432 = vrot.lane.b32.xlu1 %v368_v19, %s1441_s27  ;;  %v106_v19 = vld [vmem:[#allocation5 + $0x38] sm:$0xf]  ;;  %v228_v53 = vshll.u32 %v1082_v49, 16  ;;  %v261_v63 = vrot.slane %v1082_v49, 1 }
  0x6c   :  { %v1100_v22 = vcombine.low %v106_v19, %v107_v15  ;;  %v1090_v29 = vcombine.low %v106_v19, %v106_v19 }
  0x6d   :  { %v230_v59 = vrot.slane %v228_v53, 1 }
  0x6e   :  { %434 = vrot.lane.b32.xlu0 %v375_v23, %s1441_s27  ;;  %v400_v23 = vshll.u32 %v1098_v12, 16  ;;  %v414_v33 = vshll.u32 %v1100_v22, 16  ;;  %v459_v58 = vrot.slane %v1100_v22, 1 }
  0x6f   :  { %436 = vrot.lane.b32.xlu1 %v382_v26, %s1441_s27  ;;  %v1089_v26 = vcombine.low %v104_v16, %v104_v16 }
  0x70   :  { %v416_v41 = vrot.slane %v414_v33, 1 }
  0x72   :  { %438 = vrot.lane.b32.xlu0 %v389_v35, %s1441_s27  ;;  %v405_v35 = vshrl.u32 %v1099_v20, 16 }
  0x73   :  { %440 = vrot.lane.b32.xlu1 %v396_v40, %s1441_s27  ;;  %v412_v40 = vshrl.u32 %v1100_v22, 16 }
  0x75   :  { %v417_v48 = vor.u32 %v416_v41, %v412_v40 }
  0x76   :  { %462 = vrot.lane.b32.xlu0 %v452_v36, %s1448_s13  ;;  %v409_v36 = vrot.slane %v407_v28, 1 }
  0x77   :  { %464 = vrot.lane.b32.xlu1 %v453_v31, %s1448_s13  ;;  %v402_v31 = vrot.slane %v400_v23, 1 }
  0x78   :  { %v410_v45 = vor.u32 %v409_v36, %v405_v35 }
  0x79   :  { %v403_v39 = vor.u32 %v402_v31, %v398_v30 }
  0x7a   :  { %466 = vrot.lane.b32.xlu0 %v454_v47, %s1448_s13  ;;  %v423_v47 = vrot.slane %v421_v38, 1 }
  0x7b   :  { %468 = vrot.lane.b32.xlu1 %v455_v51, %s1448_s13 }
  0x7c   :  { %v424_v51 = vor.u32 %v423_v47, %v419_v46 }
  0x7e   :  { %470 = vrot.lane.b32.xlu0 %v456_v55, %s1448_s13  ;;  %v111_v55 = vld [vmem:[#allocation5 + $0x4c] sm:$0x1] }
  0x7f   :  { %242 = vrot.lane.b32.xlu1 %v203_v50, %s1446_s12  ;;  %v1102_v57 = vcombine.low %v110_v54, %v111_v55  ;;  %v226_v50 = vshrl.u32 %v1082_v49, 16 }
  0x81   :  { %v231_v62 = vor.u32 %v230_v59, %v226_v50 }
  0x82   :  { %244 = vrot.lane.b32.xlu0 %v210_v61, %s1446_s12  ;;  %v428_v61 = vshll.u32 %v1102_v57, 16 }
  0x83   :  { %246 = vrot.lane.b32.xlu1 %v217_v1, %s1446_s12  ;;  %v426_v1 = vshrl.u32 %v1102_v57, 16 }
  0x86   :  { %248 = vrot.lane.b32.xlu0 %v224_v3, %s1446_s12  ;;  %v430_v3 = vrot.slane %v428_v61, 1  ;;  %v1316_v61 = vld [vmem:[#allocation7 + $0x68] sm:$0xff]  }
  0x87   :  { %272 = vrot.lane.b32.xlu1 %v257_v4, %s1445_s3  ;;  %v1092_v4 = vcombine.low %v110_v54, %v110_v54 }
  0x88   :  { %v431_v6 = vor.u32 %v430_v3, %v426_v1 }
  0x8a   :  { %274 = vrot.lane.b32.xlu0 %v258_v7, %s1445_s3  ;;  %v461_v7 = vrot.slane %v1102_v57, 1 }
  0x8b   :  { %276 = vrot.lane.b32.xlu1 %v259_v11, %s1445_s3 }
  0x8e   :  { %278 = vrot.lane.b32.xlu0 %v260_v18, %s1445_s3 }
  0x8f   :  { %322 = vrot.lane.b32.xlu1 %v1088_v21, %s1447_s1 }
  0x92   :  { %324 = vrot.lane.b32.xlu0 %v1089_v26, %s1447_s1 }
  0x93   :  { %326 = vrot.lane.b32.xlu1 %v1090_v29, %s1447_s1 }
  0x96   :  { %328 = vrot.lane.b32.xlu0 %v1091_v34, %s1447_s1 }
  0x97   :  { %442 = vrot.lane.b32.xlu1 %v403_v39, %s1441_s27 }
  0x9a   :  { %444 = vrot.lane.b32.xlu0 %v410_v45, %s1441_s27 }
  0x9b   :  { %446 = vrot.lane.b32.xlu1 %v417_v48, %s1441_s27 }
  0x9e   :  { %448 = vrot.lane.b32.xlu0 %v424_v51, %s1441_s27 }
  0x9f   :  { %472 = vrot.lane.b32.xlu1 %v457_v52, %s1448_s13 }
  0xa2   :  { %474 = vrot.lane.b32.xlu0 %v458_v56, %s1448_s13 }
  0xa3   :  { %476 = vrot.lane.b32.xlu1 %v459_v58, %s1448_s13 }
  0xa6   :  { %478 = vrot.lane.b32.xlu0 %v460_v60, %s1448_s13 }
  0xa7   :  { %250 = vrot.lane.b32.xlu1 %v231_v62, %s1446_s12 }
  0xaa   :  { %280 = vrot.lane.b32.xlu0 %v261_v63, %s1445_s3 }
  0xab   :  { %330 = vrot.lane.b32.xlu1 %v1092_v4, %s1447_s1 }
  0xae   :  { %450 = vrot.lane.b32.xlu0 %v431_v6, %s1441_s27  ;;  %v1317_v6 = vld [vmem:[#allocation7 + $0x70] sm:$0xff]  }
  0xaf   :  { %480 = vrot.lane.b32.xlu1 %v461_v7, %s1448_s13 }
  0xc0   :  { %v265_v8 = vpop.permute.xlu0 %264 }
  0xc1   :  { %v263_v11 = vpop.permute.xlu1 %262 }
  0xc4   :  { %v269_v12 = vpop.permute.xlu0 %268 }
  0xc5   :  { %v267_v14 = vpop.permute.xlu1 %266 }
  0xc8   :  { %v233_v15 = vpop.permute.xlu0 %232 }
  0xc9   :  { %v271_v16 = vpop.permute.xlu1 %270  ;;  %v485_v30 = vsel %vm482_vm0, %v1541_v2, %v233_v15  ;;  %v1319_v15 = vld [vmem:[#allocation7 + $0x80] sm:$0xff]  }
  0xca   :  { %v515_v35 = vsel %vm513_vm1, %v485_v30, %v263_v11  ;;  %v1318_v11 = vld [vmem:[#allocation7 + $0x78] sm:$0xff]  }
  0xcc   :  { %v235_v18 = vpop.permute.xlu0 %234 }
  0xcd   :  { %v237_v19 = vpop.permute.xlu1 %236  ;;  %v488_v31 = vsel %vm482_vm0, %v1539_v0, %v235_v18 }
  0xce   :  { %v491_v36 = vsel %vm482_vm0, %v1548_v9, %v237_v19  ;;  %v517_v38 = vsel %vm513_vm1, %v488_v31, %v265_v8  ;;  %v1320_v19 = vld [vmem:[#allocation7 + $0x88] sm:$0xff]  }
  0xcf   :  { %v519_v47 = vsel %vm513_vm1, %v491_v36, %v267_v14 }
  0xd0   :  { %v241_v20 = vpop.permute.xlu0 %240 }
  0xd1   :  { %v239_v21 = vpop.permute.xlu1 %238  ;;  %v497_v48 = vsel %vm482_vm0, %v1551_v13, %v241_v20 }
  0xd2   :  { %v494_v2 = vsel %vm482_vm0, %v1544_v5, %v239_v21  ;;  %v523_v58 = vsel %vm513_vm1, %v497_v48, %v271_v16 }
  0xd3   :  { %v521_v5 = vsel %vm513_vm1, %v494_v2, %v269_v12 }
  0xd4   :  { %v313_v22 = vpop.permute.xlu0 %312 }
  0xd5   :  { %v315_v23 = vpop.permute.xlu1 %314  ;;  %v536_v39 = vsel %vm534_vm2, %v515_v35, %v313_v22 }
  0xd6   :  { %v538_v40 = vsel %vm534_vm2, %v517_v38, %v315_v23 }
  0xd8   :  { %v317_v24 = vpop.permute.xlu0 %316 }
  0xd9   :  { %v319_v25 = vpop.permute.xlu1 %318  ;;  %v540_v49 = vsel %vm534_vm2, %v519_v47, %v317_v24 }
  0xda   :  { %v542_v52 = vsel %vm534_vm2, %v521_v5, %v319_v25 }
  0xdc   :  { %v321_v26 = vpop.permute.xlu0 %320 }
  0xdd   :  { %v433_v27 = vpop.permute.xlu1 %432  ;;  %v544_v59 = vsel %vm534_vm2, %v523_v58, %v321_v26 }
  0xde   :  { %v557_v0 = vsel %vm555_vm3, %v536_v39, %v433_v27 }
  0xe0   :  { %v435_v28 = vpop.permute.xlu0 %434 }
  0xe1   :  { %v437_v29 = vpop.permute.xlu1 %436  ;;  %v559_v44 = vsel %vm555_vm3, %v538_v40, %v435_v28 }
  0xe2   :  { %v561_v53 = vsel %vm555_vm3, %v540_v49, %v437_v29 }
  0xe4   :  { %v439_v33 = vpop.permute.xlu0 %438 }
  0xe5   :  { %v441_v34 = vpop.permute.xlu1 %440  ;;  %v563_v55 = vsel %vm555_vm3, %v542_v52, %v439_v33 }
  0xe6   :  { %v565_v62 = vsel %vm555_vm3, %v544_v59, %v441_v34 }
  0xe8   :  { %v463_v41 = vpop.permute.xlu0 %462 }
  0xe9   :  { %v465_v45 = vpop.permute.xlu1 %464  ;;  %v578_v46 = vsel %vm576_vm4, %v557_v0, %v463_v41 }
  0xea   :  { %v580_v9 = vsel %vm576_vm4, %v559_v44, %v465_v45 }
  0xeb   :  { %v1117_v51 = vcombine.low %v578_v46, %v580_v9 }
  0xec   :  { %v467_v54 = vpop.permute.xlu0 %466 }
  0xed   :  { %v469_v56 = vpop.permute.xlu1 %468  ;;  %1206 = vmatprep.mubr.msk.bf16.mxu0 %vm678_vm5, %v1117_v51  ;;  %v582_v57 = vsel %vm576_vm4, %v561_v53, %v467_v54 }
  0xee   :  { %v584_v13 = vsel %vm576_vm4, %v563_v55, %v469_v56  ;;  %v1103_v50 = vcombine.low %v580_v9, %v582_v57 }
  0xef   :  { %v1682_v60 = vcombine.low %v582_v57, %v584_v13 }
  0xf0   :  { %1186 = vmatprep.mubr.msk.bf16.mxu1 %vm678_vm5, %v1103_v50  ;;  %v471_v63 = vpop.permute.xlu0 %470 }
  0xf1   :  { %v243_v1 = vpop.permute.xlu1 %242  ;;  %1207 = vmatmul.mubr.msk.bf16.vlgmr.msra.gmra.mrb[0].mxu0 %vm678_vm5, %v1682_v60  ;;  %v586_v3 = vsel %vm576_vm4, %v565_v62, %v471_v63 }
  0xf2   :  { %v1104_v4 = vcombine.low %v584_v13, %v586_v3  ;;  %1215 = vmatpush3.bf16.msra.mxu0 %v1625_v10  ;;  %v500_v27 = vsel %vm482_vm0, %v1584_v17, %v243_v1 }
  0xf3   :  { %1216 = vmatprep.subr.bf16.mxu0 %v1316_v61 }
  0xf4   :  { %1187 = vmatmul.mubr.msk.bf16.vlgmr.msra.gmra.mrb[0].mxu1 %vm678_vm5, %v1104_v4  ;;  %v245_v7 = vpop.permute.xlu0 %244 }
  0xf5   :  { %v247_v8 = vpop.permute.xlu1 %246  ;;  %1240 = vmatpush3.bf16.msra.mxu1 %v1625_v10  ;;  %v503_v31 = vsel %vm482_vm0, %v1596_v32, %v245_v7 }
  0xf6   :  { %1217 = vmatpush3.bf16.msra.mxu0 %v1316_v61  ;;  %1235 = vmatprep.subr.bf16.mxu1 %v1316_v61  ;;  %v506_v35 = vsel %vm482_vm0, %v1600_v37, %v247_v8 }
  0xf7   :  { %1218 = vmatprep.subr.bf16.mxu0 %v1317_v6 }
  0xf8   :  { %v249_v12 = vpop.permute.xlu0 %248 }
  0xf9   :  { %v273_v14 = vpop.permute.xlu1 %272  ;;  %1241 = vmatpush3.bf16.msra.mxu1 %v1316_v61  ;;  %v509_v41 = vsel %vm482_vm0, %v1604_v43, %v249_v12 }
  0xfa   :  { %1219 = vmatpush3.bf16.msra.mxu0 %v1317_v6  ;;  %1236 = vmatprep.subr.bf16.mxu1 %v1317_v6  ;;  %v525_v28 = vsel %vm513_vm1, %v500_v27, %v273_v14 }
  0xfb   :  { %1220 = vmatprep.subr.bf16.mxu0 %v1318_v11 }
  0xfc   :  { %v275_v16 = vpop.permute.xlu0 %274 }
  0xfd   :  { %v277_v18 = vpop.permute.xlu1 %276  ;;  %1242 = vmatpush3.bf16.msra.mxu1 %v1317_v6  ;;  %v527_v36 = vsel %vm513_vm1, %v503_v31, %v275_v16 }
  0xfe   :  { %1221 = vmatpush3.bf16.msra.mxu0 %v1318_v11  ;;  %1237 = vmatprep.subr.bf16.mxu1 %v1318_v11  ;;  %v529_v17 = vsel %vm513_vm1, %v506_v35, %v277_v18 }
  0xff   :  { %1222 = vmatprep.subr.bf16.mxu0 %v1319_v15 }
 0x100   :  { %v279_v20 = vpop.permute.xlu0 %278 }
 0x101   :  { %v323_v10 = vpop.permute.xlu1 %322  ;;  %1243 = vmatpush3.bf16.msra.mxu1 %v1318_v11  ;;  %v531_v46 = vsel %vm513_vm1, %v509_v41, %v279_v20 }
 0x102   :  { %1223 = vmatpush3.bf16.msra.mxu0 %v1319_v15  ;;  %1238 = vmatprep.subr.bf16.mxu1 %v1319_v15  ;;  %v546_v29 = vsel %vm534_vm2, %v525_v28, %v323_v10  ;;  %v1142_v10 = vld [vmem:[#allocation8] ss:$0 sm:$0xff] }
 0x103   :  { %1224 = vmatprep.subr.bf16.mxu0 %v1320_v19 }
 0x104   :  { %v325_v21 = vpop.permute.xlu0 %324 }
 0x105   :  { %v327_v22 = vpop.permute.xlu1 %326  ;;  %1244 = vmatpush3.bf16.msra.mxu1 %v1319_v15  ;;  %v548_v39 = vsel %vm534_vm2, %v527_v36, %v325_v21 }
 0x106   :  { %1225 = vmatpush3.bf16.msra.mxu0 %v1320_v19  ;;  %1239 = vmatprep.subr.bf16.mxu1 %v1320_v19  ;;  %v550_v40 = vsel %vm534_vm2, %v529_v17, %v327_v22 }
 0x108   :  { %v329_v23 = vpop.permute.xlu0 %328 }
 0x109   :  { %v443_v24 = vpop.permute.xlu1 %442  ;;  %1245 = vmatpush3.bf16.msra.mxu1 %v1320_v19  ;;  %v552_v48 = vsel %vm534_vm2, %v531_v46, %v329_v23  ;;  %v1143_v23 = vld [vmem:[#allocation8 + $0x1] ss:$0 sm:$0xff] }
 0x10a   :  { %v567_v33 = vsel %vm555_vm3, %v546_v29, %v443_v24 }
 0x10c   :  { %v445_v25 = vpop.permute.xlu0 %444 }
 0x10d   :  { %v447_v26 = vpop.permute.xlu1 %446  ;;  %v569_v0 = vsel %vm555_vm3, %v548_v39, %v445_v25 }
 0x10e   :  { %v571_v44 = vsel %vm555_vm3, %v550_v40, %v447_v26 }
 0x110   :  { %v449_v30 = vpop.permute.xlu0 %448 }
 0x111   :  { %v473_v34 = vpop.permute.xlu1 %472  ;;  %v573_v49 = vsel %vm555_vm3, %v552_v48, %v449_v30 }
 0x112   :  { %v588_v38 = vsel %vm576_vm4, %v567_v33, %v473_v34 }
 0x113   :  { %v1119_v2 = vcombine.low %v586_v3, %v588_v38 }
 0x114   :  { %v475_v32 = vpop.permute.xlu0 %474 }
 0x115   :  { %v477_v37 = vpop.permute.xlu1 %476  ;;  %1210 = vmatprep.mubr.msk.bf16.mxu0 %vm678_vm5, %v1119_v2  ;;  %v590_v45 = vsel %vm576_vm4, %v569_v0, %v475_v32 }
 0x116   :  { %v592_v47 = vsel %vm576_vm4, %v571_v44, %v477_v37  ;;  %v1105_v9 = vcombine.low %v588_v38, %v590_v45 }
 0x117   :  { %v1120_v5 = vcombine.low %v590_v45, %v592_v47 }
 0x118   :  { %1190 = vmatprep.mubr.msk.bf16.mxu1 %vm678_vm5, %v1105_v9  ;;  %v479_v43 = vpop.permute.xlu0 %478 }
 0x119   :  { %1211 = vmatmul.mubr.msk.bf16.gmra.mrb[4].mxu0 %vm678_vm5, %v1120_v5  ;;  %v594_v51 = vsel %vm576_vm4, %v573_v49, %v479_v43  ;;  %v251_v52 = vpop.permute.xlu1 %250 }
 0x11a   :  { %v1106_v53 = vcombine.low %v592_v47, %v594_v51  ;;  %1226 = vmatprep.mubr.msk.bf16.mxu0 %vm678_vm5, %v1682_v60  ;;  %v512_v54 = vsel %vm482_vm0, %v1636_v42, %v251_v52 }
 0x11c   :  { %1191 = vmatmul.mubr.msk.bf16.gmra.mrb[4].mxu1 %vm678_vm5, %v1106_v53  ;;  %v281_v55 = vpop.permute.xlu0 %280 }
 0x11d   :  { %v533_v56 = vsel %vm513_vm1, %v512_v54, %v281_v55  ;;  %v331_v57 = vpop.permute.xlu1 %330  ;;  %1230 = vmatprep.mubr.msk.bf16.mxu1 %vm678_vm5, %v1120_v5 }
 0x11e   :  { %v554_v58 = vsel %vm534_vm2, %v533_v56, %v331_v57 }
 0x120   :  { %v451_v13 = vpop.permute.xlu0 %450 }
 0x121   :  { %1227 = vmatmul.mubr.msk.bf16.vlgmr.msra.gmra.mrb[0].mxu0 %vm678_vm5, %v1119_v2  ;;  %v575_v50 = vsel %vm555_vm3, %v554_v58, %v451_v13  ;;  %v481_v59 = vpop.permute.xlu1 %480 }
 0x122   :  { %v596_v60 = vsel %vm576_vm4, %v575_v50, %v481_v59 }
 0x123   :  { %v1131_v61 = vcombine.low %v594_v51, %v596_v60 }
 0x125   :  { %1231 = vmatmul.mubr.msk.bf16.vlgmr.msra.gmra.mrb[8].mxu1 %vm678_vm5, %v1131_v61 }
 0x1c7   :  { %v1188_v42 = vpop.f32.mrb[0].mxu1 }
 0x1c8   :  { %v725_v62 = vpop.f32.mrb[1].mxu1 }
 0x1c9   :  { %v1189_v63 = vpop.f32.mrb[2].mxu1 }
 0x1ca   :  { %v728_v1 = vpop.f32.mrb[3].mxu1 }
 0x1ec   :  { %v1212_v3 = vpop.f32.mrb[4].mxu0 }
 0x1ed   :  { %v860_v4 = vpop.f32.mrb[5].mxu0 }
 0x1ee   :  { %v1213_v6 = vpop.f32.mrb[6].mxu0 }
 0x1ef   :  { %v863_v7 = vpop.f32.mrb[7].mxu0  ;;  %v1192_v8 = vpop.f32.mrb[4].mxu1 }
 0x1f0   :  { %v869_v11 = vadd.f32 %v1212_v3, %v1192_v8  ;;  %v741_v12 = vpop.f32.mrb[5].mxu1 }
 0x1f1   :  { %v861_v14 = vadd.f32 %v860_v4, %v741_v12  ;;  %v1193_v15 = vpop.f32.mrb[6].mxu1 }
 0x1f2   :  { %v872_v16 = vadd.f32 %v1213_v6, %v1193_v15  ;;  %v744_v18 = vpop.f32.mrb[7].mxu1 }
 0x1f3   :  { %v864_v19 = vadd.f32 %v863_v7, %v744_v18 }
 0x1f4   :  { %v1228_v20 = vpop.f32.mrb[0].mxu0 }
 0x1f5   :  { %v1246_v21 = vadd.f32 %v1228_v20, %v1188_v42  ;;  %v964_v22 = vpop.f32.mrb[1].mxu0 }
 0x1f6   :  { %v1247_v24 = vadd.f32 %v964_v22, %v725_v62  ;;  %v1229_v25 = vpop.f32.mrb[2].mxu0 }
 0x1f7   :  { %v1010_v26 = vmul.f32 %v1246_v21, %v1142_v10  ;;  %v1248_v27 = vadd.f32 %v1229_v25, %v1189_v63  ;;  %v967_v28 = vpop.f32.mrb[3].mxu0 }
 0x1f8   :  { %v1008_v29 = vmul.f32 %v1247_v24, %v1142_v10  ;;  %v1249_v30 = vadd.f32 %v967_v28, %v728_v1  ;;  %v1232_v31 = vpop.f32.mrb[8].mxu1 }
 0x1f9   :  { %v1023_v33 = vadd.f32 %v1143_v23, %v1010_v26  ;;  %v1011_v34 = vmul.f32 %v1248_v27, %v1142_v10  ;;  %v1001_v35 = vadd.f32 %v1232_v31, %v869_v11  ;;  %v980_v36 = vpop.f32.mrb[9].mxu1 }
 0x1fa   :  { %v1021_v38 = vadd.f32 %v1143_v23, %v1008_v29  ;;  %v1009_v17 = vmul.f32 %v1249_v30, %v1142_v10  ;;  %v999_v39 = vadd.f32 %v980_v36, %v861_v14  ;;  %v1233_v2 = vpop.f32.mrb[10].mxu1 }
 0x1fb   :  { %v1031_v40 = vmax.f32 %v1023_v33, 0.0  ;;  %v1024_v0 = vadd.f32 %v1143_v23, %v1011_v34  ;;  %v1014_v32 = vmul.f32 %v1142_v10, %v1001_v35  ;;  %v1002_v41 = vadd.f32 %v1233_v2, %v872_v16  ;;  %v983_v44 = vpop.f32.mrb[11].mxu1 }
 0x1fc   :  { %v1029_v37 = vmax.f32 %v1021_v38, 0.0  ;;  %v1022_v45 = vadd.f32 %v1143_v23, %v1009_v17  ;;  %v1012_v46 = vmul.f32 %v1142_v10, %v999_v39  ;;  %v1000_v47 = vadd.f32 %v983_v44, %v864_v19 }
 0x1fd   :  { %v1039_v9 = vpack.c.bf16 %v1031_v40, %v1031_v40  ;;  %v1032_v48 = vmax.f32 %v1024_v0, 0.0  ;;  %v1027_v5 = vadd.f32 %v1143_v23, %v1014_v32  ;;  %v1015_v49 = vmul.f32 %v1142_v10, %v1002_v41 }
 0x1fe   :  { %v1037_v43 = vpack.c.bf16 %v1029_v37, %v1029_v37  ;;  %v1030_v51 = vmax.f32 %v1022_v45, 0.0  ;;  %v1025_v52 = vadd.f32 %v1143_v23, %v1012_v46  ;;  %v1013_v53 = vmul.f32 %v1142_v10, %v1000_v47 }
 0x1ff   :  { %1048 = vst.msk [vmem:[#allocation10 + $0x8] sm:$0xf] %vm1045_vm6, %v1039_v9  ;;  %v1040_v54 = vpack.c.bf16 %v1032_v48, %v1032_v48  ;;  %v1035_v55 = vmax.f32 %v1027_v5, 0.0  ;;  %v1028_v56 = vadd.f32 %v1143_v23, %v1015_v49 }
 0x200   :  { %1046 = vst.msk [vmem:[#allocation10] sm:$0xf] %vm1045_vm6, %v1037_v43  ;;  %v1038_v57 = vpack.c.bf16 %v1030_v51, %v1030_v51  ;;  %v1033_v58 = vmax.f32 %v1025_v52, 0.0  ;;  %v1026_v13 = vadd.f32 %v1143_v23, %v1013_v53 }
 0x201   :  { %1049 = vst.msk [vmem:[#allocation10 + $0xc] sm:$0xf] %vm1045_vm6, %v1040_v54  ;;  %v1043_v50 = vpack.c.bf16 %v1035_v55, %v1035_v55  ;;  %v1036_v59 = vmax.f32 %v1028_v56, 0.0 }
 0x202   :  { %1047 = vst.msk [vmem:[#allocation10 + $0x4] sm:$0xf] %vm1045_vm6, %v1038_v57  ;;  %v1041_v60 = vpack.c.bf16 %v1033_v58, %v1033_v58  ;;  %v1034_v61 = vmax.f32 %v1026_v13, 0.0 }
 0x203   :  { %1052 = vst.msk [vmem:[#allocation10 + $0x18] sm:$0xf] %vm1045_vm6, %v1043_v50  ;;  %v1044_v42 = vpack.c.bf16 %v1036_v59, %v1036_v59 }
 0x204   :  { %1050 = vst.msk [vmem:[#allocation10 + $0x10] sm:$0xf] %vm1045_vm6, %v1041_v60  ;;  %v1042_v62 = vpack.c.bf16 %v1034_v61, %v1034_v61 }
 0x205   :  { %1053 = vst.msk [vmem:[#allocation10 + $0x1c] sm:$0xf] %vm1045_vm6, %v1044_v42 }
 0x206   :  { %1051 = vst.msk [vmem:[#allocation10 + $0x14] sm:$0xf] %vm1045_vm6, %v1042_v62 }
 0x207   :  { %1420 = shalt.err (!%p1417_p8)
}
 0x208   :  { %s1421_s20 = scalar_lea.hbm %s1758_s4, 512 }
 0x209   :  { %p1422_p9 = scmp.ne.s32.totalorder %s1758_s4, %s1421_s20  ;;  %p1425_p10 = scmp.lt.u32.totalorder %s1421_s20, %s1758_s4 }
 0x20b   :  { %p1427_p11 = pnand %p1425_p10, %p1422_p9 }
 0x20d   :  { %1430 = shalt.err (!%p1427_p11)
}
 0x20e   :  { %1065 = dma.vmem_to_hbm [thread:$0]  %s1060_s15, 512, %s1758_s4, [#allocation4], %s1441_s27, %s1441_s27, %s1442_s28  }
 0x20f   :  { %1437 = dma.done.wait [#allocation4], 512  }
 0x210   :  { %1438 = vsyncadd [#allocation4], 4294966784 }
 0x211   :  { %1069 = vsyncpa [#allocation3], 1 }
 0x212   :  { %1070 = vsyncpa [#allocation6], 1 }
 0x213   :  { %1071 = vsyncpa [#allocation9], 1 }
 0x214   :  { %1072 = vsyncpa [#allocation4], 1 }

</bundles_post_ra>
